<compile_context>
chip_gen: v7x
topology: tpu7x:2x2x1
jax: 0.10.0
libtpu: 0.0.40
codegen_flags: <defaults>
</compile_context>

<pallas_src>
import functools
import math

import jax
import jax.numpy as jnp
from jax.experimental import pallas as pl
from jax.experimental.pallas import tpu as pltpu


def _round_up(x, m):
    return ((x + m - 1) // m) * m


def _vmem_capacity_bytes():
    """Physical VMEM per TensorCore, used to budget the batch tile."""
    try:
        return int(pltpu.get_tpu_info().vmem_capacity_bytes)
    except Exception:
        pass
    try:
        kind = jax.devices()[0].device_kind.lower()
    except Exception:
        kind = ""
    if "v7" in kind:
        return 64 << 20
    if any(v in kind for v in ("v4", "v5", "v6")):
        return 128 << 20
    return 64 << 20  # conservative default


def _attn_weights_kernel(wes_ref, mask_ref, kv_ref, kb_ref, out_ref):
    # wes_ref : [tB, L, in_s]  item embeddings block (native dtype, streamed)
    # mask_ref: [tB, L]        instance['mask_x'] block (native dtype)
    # kv_ref  : [1, in_s]      (key_p^T W) * (m_score / scale), f32
    # kb_ref  : [1, 1]         (key_p^T b) * (m_score / scale), f32
    x = wes_ref[...].astype(jnp.float32)            # f32 accumulate (v5e: no bf16 VPU)
    kv = kv_ref[...].reshape(1, 1, -1)              # [1, 1, in_s]

    # nl == Identity  =>  scores*mask*m_score/scale == (x·kv' + kb') * mask
    # (kv', kb' already carry the m_score/scale factor, hoisted to the wrapper).
    # NOTE: if a bundle dump shows the XLU lane-reduce saturating before the HBM
    # roofline, reformulate as an MXU matmul of [tB*L, in_s] @ [in_s, 1].
    scores = jnp.sum(x * kv, axis=-1) + kb_ref[...]                # [tB, L]
    masked = scores * mask_ref[...].astype(jnp.float32)            # [tB, L]

    # softmax over the bag/sequence axis (PyTorch nn.Softmax(dim=1))
    m = jnp.max(masked, axis=-1, keepdims=True)
    e = jnp.exp(masked - m)
    denom = jnp.sum(e, axis=-1, keepdims=True)                     # [tB, 1]
    out_ref[...] = e * pl.reciprocal(denom, approx=True)           # EUP recip


def dot_product_attention_weights(indices, w_es, instance, query_w, query_b,
                                  key_p, *, scale=None,
                                  masked_item_score=1e-19):
    """Pallas forward for DotProductAttentionWeights (nl=Identity, Linear query)."""
    # TODO(synk): `indices` is unused by the PyTorch forward as well; kept for
    # signature parity.
    # TODO(synk): only nl=Identity and one_hot_input=False (nn.Linear query_tfm)
    # are implemented; a non-identity `nl` breaks the key-fold identity.
    del indices
    mask_x = instance["mask_x"]

    B, L, in_s = w_es.shape
    key_s = key_p.shape[0]
    if scale is None:
        scale = math.sqrt(key_s)           # PyTorch default: np.sqrt(key_s)

    # Keep big activations in their native dtype; only coerce a bool/int mask.
    if not jnp.issubdtype(mask_x.dtype, jnp.floating):
        mask_x = mask_x.astype(jnp.float32)

    # ---- Hoisted key-fold on tiny parameter tensors (not the anti-pattern:
    # these are parameters, not streamed activations). -----------------------
    c = float(masked_item_score) / float(scale)
    key_f = key_p.astype(jnp.float32)
    kv = (jnp.dot(key_f, query_w.astype(jnp.float32)) * c).reshape(1, in_s)
    kb = (jnp.dot(key_f, query_b.astype(jnp.float32)) * c).reshape(1, 1)

    # ---- VMEM-budget-driven batch tile -------------------------------------
    vmem_cap = _vmem_capacity_bytes()
    block_budget = vmem_cap // 8          # per w_es block (Pallas double-buffers)
    bytes_per_row = L * in_s * w_es.dtype.itemsize
    t_b = max(8, (block_budget // max(bytes_per_row, 1)) // 8 * 8)

    b_pad8 = _round_up(B, 8)
    t_b = min(t_b, b_pad8)
    if b_pad8 >= 16:
        # keep >= 2 grid blocks so the v7x megacore can shard the "parallel" axis
        t_b = min(t_b, _round_up(b_pad8 // 2, 8))
    b_padded = _round_up(B, t_b)
    grid = (b_padded // t_b,)

    if b_padded != B:
        pad = b_padded - B
        w_es_in = jnp.pad(w_es, ((0, pad), (0, 0), (0, 0)))
        mask_in = jnp.pad(mask_x, ((0, pad), (0, 0)))
    else:
        w_es_in, mask_in = w_es, mask_x

    # ---- Explicit VMEM limit from actual block sizes (v7x has only 64 MiB) --
    wes_block = t_b * L * in_s * w_es.dtype.itemsize
    small_blocks = t_b * L * (mask_in.dtype.itemsize + 4)      # mask + f32 out
    need = 2 * (wes_block + small_blocks) + 2 * (in_s + 1) * 4
    vmem_limit = int(min(vmem_cap - (8 << 20),
                         max(need + (16 << 20), 32 << 20)))

    flops = 2 * b_padded * L * in_s + 8 * b_padded * L
    bytes_accessed = (b_padded * L * in_s * w_es.dtype.itemsize
                      + b_padded * L * (mask_in.dtype.itemsize + 4)
                      + grid[0] * (in_s + 1) * 4)

    out = pl.pallas_call(
        _attn_weights_kernel,
        out_shape=jax.ShapeDtypeStruct((b_padded, L), jnp.float32),
        grid=grid,
        in_specs=[
            pl.BlockSpec((t_b, L, in_s), lambda b: (b, 0, 0)),   # w_es (streamed)
            pl.BlockSpec((t_b, L), lambda b: (b, 0)),            # mask_x
            pl.BlockSpec((1, in_s), lambda b: (0, 0)),           # folded key^T W
            pl.BlockSpec((1, 1), lambda b: (0, 0)),              # folded key^T b
        ],
        out_specs=pl.BlockSpec((t_b, L), lambda b: (b, 0)),
        compiler_params=pltpu.CompilerParams(
            dimension_semantics=("parallel",),
            vmem_limit_bytes=vmem_limit),
        cost_estimate=pl.CostEstimate(
            flops=int(flops),
            transcendentals=int(b_padded * L + b_padded),
            bytes_accessed=int(bytes_accessed)),
    )(w_es_in, mask_in, kv, kb)

    return out[:B] if b_padded != B else out


def _reference_forward(w_es, mask_x, query_w, query_b, key_p, *, scale, m_score):
    # Follows the PyTorch op order exactly (query first, then dot with key_p).
    query = jnp.einsum("bli,ki->blk", w_es.astype(jnp.float32),
                       query_w.astype(jnp.float32)) + query_b    # [B, L, key_s]
    scores = jnp.einsum("blk,k->bl", query, key_p.astype(jnp.float32)) / scale
    masked = scores * (mask_x.astype(jnp.float32) * m_score)
    return jax.nn.softmax(masked, axis=1)


if __name__ == "__main__":
    root = jax.random.PRNGKey(0)
    k_wes, k_w, k_b, k_key = jax.random.split(root, 4)

    B, L = 2, 8           # batch, bag length
    in_s, key_s = 32, 16  # input embedding dim, attention key dim

    w_es = jax.random.normal(k_wes, (B, L, in_s), jnp.float32) * 0.5
    # mask_x: 1 for real tokens, 0 for padding (tail of row 1 padded)
    lengths = jnp.array([L, L - 3])
    mask_x = (jnp.arange(L)[None, :] < lengths[:, None]).astype(jnp.float32)

    query_w = jax.random.normal(k_w, (key_s, in_s), jnp.float32) * 0.2
    query_b = jax.random.normal(k_b, (key_s,), jnp.float32) * 0.1
    # key_p is zero-initialized in the module; random here to exercise the math.
    key_p = jax.random.normal(k_key, (key_s,), jnp.float32) * 0.3

    indices = jnp.zeros((B, L), jnp.int32)     # unused (signature parity)
    instance = {"mask_x": mask_x}
    scale = math.sqrt(key_s)

    # Module default masked_item_score (1e-19) plus a non-degenerate value so
    # the score arithmetic is exercised meaningfully.  Tolerance is 2e-3 to
    # accommodate the EUP approximate reciprocal in the softmax epilogue.
    for m_score in (1e-19, 1.0):
        out = dot_product_attention_weights(indices, w_es, instance,
                                            query_w, query_b, key_p,
                                            masked_item_score=m_score)
        jax.block_until_ready(out)
        ref = _reference_forward(w_es, mask_x, query_w, query_b, key_p,
                                 scale=scale, m_score=m_score)
        assert out.shape == (B, L)
        assert jnp.allclose(out, ref, atol=2e-3, rtol=2e-3), (m_score, out, ref)
        assert jnp.allclose(out.sum(axis=1), jnp.ones((B,)), atol=2e-3)

    print("KERNEL_OK")
</pallas_src>

<mosaic_0001>
module attributes {stable_mosaic.version = 11 : i64} {
  func.func @_attn_weights_kernel(%arg0: i32, %arg1: memref<8x8x32xf32, #tpu.memory_space<vmem>>, %arg2: memref<8x8xf32, #tpu.memory_space<vmem>>, %arg3: memref<1x32xf32, #tpu.memory_space<vmem>>, %arg4: memref<1x1xf32, #tpu.memory_space<vmem>>, %arg5: memref<8x8xf32, #tpu.memory_space<vmem>>) attributes {dimension_semantics = [#tpu.dimension_semantics<parallel>], iteration_bounds = array<i64: 1>, scalar_prefetch = 0 : i64, scratch_operands = 0 : i64, tpu.core_type = #tpu.core_type<tc>, window_params = [{transform_indices = @transform_0, window_bounds = array<i64: 8, 8, 32>}, {transform_indices = @transform_1, window_bounds = array<i64: 8, 8>}, {pipeline_mode = #tpu.pipeline_mode<synchronous>, transform_indices = @transform_2, window_bounds = array<i64: 1, 32>}, {pipeline_mode = #tpu.pipeline_mode<synchronous>, transform_indices = @transform_3, window_bounds = array<i64: 1, 1>}, {transform_indices = @transform_4, window_bounds = array<i64: 8, 8>}]} {
    %c0 = arith.constant 0 : index
    %c0_0 = arith.constant 0 : index
    %c0_1 = arith.constant 0 : index
    %0 = vector.load %arg1[%c0, %c0_0, %c0_1] : memref<8x8x32xf32, #tpu.memory_space<vmem>>, vector<8x8x32xf32>
    %c0_2 = arith.constant 0 : index
    %c0_3 = arith.constant 0 : index
    %1 = vector.load %arg3[%c0_2, %c0_3] : memref<1x32xf32, #tpu.memory_space<vmem>>, vector<1x32xf32>
    %2 = vector.shape_cast %1 : vector<1x32xf32> to vector<1x1x32xf32>
    %3 = vector.broadcast %2 : vector<1x1x32xf32> to vector<8x8x32xf32>
    %4 = arith.mulf %0, %3 : vector<8x8x32xf32>
    %cst = arith.constant dense<0.000000e+00> : vector<8x8xf32>
    %5 = vector.multi_reduction <add>, %4, %cst [2] : vector<8x8x32xf32> to vector<8x8xf32>
    %c0_4 = arith.constant 0 : index
    %c0_5 = arith.constant 0 : index
    %6 = vector.load %arg4[%c0_4, %c0_5] : memref<1x1xf32, #tpu.memory_space<vmem>>, vector<1x1xf32>
    %7 = vector.broadcast %6 : vector<1x1xf32> to vector<8x8xf32>
    %8 = arith.addf %5, %7 : vector<8x8xf32>
    %c0_6 = arith.constant 0 : index
    %c0_7 = arith.constant 0 : index
    %9 = vector.load %arg2[%c0_6, %c0_7] : memref<8x8xf32, #tpu.memory_space<vmem>>, vector<8x8xf32>
    %10 = arith.mulf %8, %9 : vector<8x8xf32>
    %cst_8 = arith.constant dense<0xFF800000> : vector<8xf32>
    %11 = vector.multi_reduction <maximumf>, %10, %cst_8 [1] : vector<8x8xf32> to vector<8xf32>
    %12 = vector.shape_cast %11 : vector<8xf32> to vector<8x1xf32>
    %13 = vector.broadcast %12 : vector<8x1xf32> to vector<8x8xf32>
    %14 = arith.subf %10, %13 : vector<8x8xf32>
    %15 = math.exp %14 : vector<8x8xf32>
    %cst_9 = arith.constant dense<0.000000e+00> : vector<8xf32>
    %16 = vector.multi_reduction <add>, %15, %cst_9 [1] : vector<8x8xf32> to vector<8xf32>
    %17 = vector.shape_cast %16 : vector<8xf32> to vector<8x1xf32>
    %18 = tpu.reciprocal %17 {approx = true} : vector<8x1xf32> -> vector<8x1xf32>
    %19 = vector.broadcast %18 : vector<8x1xf32> to vector<8x8xf32>
    %20 = arith.mulf %15, %19 : vector<8x8xf32>
    %c0_10 = arith.constant 0 : index
    %c0_11 = arith.constant 0 : index
    %21 = vector.load %arg5[%c0_10, %c0_11] : memref<8x8xf32, #tpu.memory_space<vmem>>, vector<8x8xf32>
    tpu.vector_store %arg5[%c0_10, %c0_11], %20 {strides = array<i32>} : memref<8x8xf32, #tpu.memory_space<vmem>>, vector<8x8xf32>,
    return
  }
  func.func @transform_0(%arg0: i32) -> (i32, i32, i32) {
    %c0_i32 = arith.constant 0 : i32
    %c0_i32_0 = arith.constant 0 : i32
    %c0_i32_1 = arith.constant 0 : i32
    return %arg0, %c0_i32, %c0_i32_0 : i32, i32, i32
  }
  func.func @transform_1(%arg0: i32) -> (i32, i32) {
    %c0_i32 = arith.constant 0 : i32
    %c0_i32_0 = arith.constant 0 : i32
    return %arg0, %c0_i32 : i32, i32
  }
  func.func @transform_2(%arg0: i32) -> (i32, i32) {
    %c0_i32 = arith.constant 0 : i32
    %c0_i32_0 = arith.constant 0 : i32
    %c0_i32_1 = arith.constant 0 : i32
    return %c0_i32, %c0_i32_0 : i32, i32
  }
  func.func @transform_3(%arg0: i32) -> (i32, i32) {
    %c0_i32 = arith.constant 0 : i32
    %c0_i32_0 = arith.constant 0 : i32
    %c0_i32_1 = arith.constant 0 : i32
    return %c0_i32, %c0_i32_0 : i32, i32
  }
  func.func @transform_4(%arg0: i32) -> (i32, i32) {
    %c0_i32 = arith.constant 0 : i32
    %c0_i32_0 = arith.constant 0 : i32
    return %arg0, %c0_i32 : i32, i32
  }
}

</mosaic_0001>

<bundles_post_ra>
// kernel: tpu_custom_call.1
= control target key start
LH: loop header
LB: loop body
LE: loop exit
PB: predicated region body
PF: predicated region fallthrough
CT: control target
= control target key end

     0   :  { %s853_s0 = inlined_call_operand.hbm [shape: f32[8,8,32], index: 0, kind: input, shape index: {}]   ;;  %s854_s1 = inlined_call_operand.hbm [shape: f32[8,8], index: 1, kind: input, shape index: {}]   ;;  %s855_s2 = inlined_call_operand.vmem [shape: f32[1,32], index: 2, kind: input, shape index: {}]   ;;  %s856_s3 = inlined_call_operand.<no memory space> [shape: f32[1,1], index: 3, kind: input, shape index: {}]   ;;  %s857_s4 = inlined_call_operand.hbm [shape: f32[8,8], index: 4, kind: output, shape index: {}]  }
   0x1   :  { %v9_v0 = vstv %s856_s3 }
   0x2   :  { %10 = vst [vmem:[#allocation2] sm:$0x1] %v9_v0 }
   0x3   :  { %11 = vsyncpa [#allocation4], 0 }
   0x4   :  { %12 = vsyncpa [#allocation7], 0 }
   0x5   :  { %13 = vsyncpa [#allocation5], 0  ;;  %s650_s17 = smov [#allocation3]   ;;  %s578_s21 = scalar_lea.hbm %s853_s0, 1024 }
   0x6   :  { %s19_s18 = sshll.u32 %s650_s17, 4  ;;  %p579_p0 = scmp.ne.s32.totalorder %s853_s0, %s578_s21  ;;  %s20_s18 = int_to_ptr.vmem [resolvable:$true] %s19_s18 }
   0x7   :  { %p582_p1 = scmp.lt.u32.totalorder %s578_s21, %s853_s0 }
   0x9   :  { %p584_p2 = pnand %p582_p1, %p579_p0 }
   0xb   :  { %587 = shalt.err (!%p584_p2)
}
   0xc   :  { %s588_s3 = scalar_lea.vmem %s20_s18, 1024  ;;  %p593_p4 = scmp.lt.s32.totalorder %s20_s18, %s20_s18 }
   0xd   :  { %p589_p3 = scmp.ne.s32.totalorder %s20_s18, %s588_s3  ;;  %p594_p5 = scmp.lt.s32.totalorder %s588_s3, %s588_s3 }
   0xf   :  { %p595_p6 = por %p594_p5, %p593_p4 }
  0x11   :  { %p596_p7 = pnand %p595_p6, %p589_p3 }
  0x13   :  { %599 = shalt.err (!%p596_p7)
}
  0x14   :  { %s651_s26 = smov 128   ;;  %s652_s27 = smov 8  }
  0x15   :  { %25 = dma.hbm_to_vmem [thread:$0]  %s853_s0, 1024, %s20_s18, [#allocation4], %s651_s26, %s651_s26, %s652_s27  }
  0x16   :  { %s653_s30 = smov [#allocation6]   ;;  %s600_s8 = scalar_lea.hbm %s854_s1, 128 }
  0x17   :  { %s32_s5 = sshll.u32 %s653_s30, 4  ;;  %p601_p8 = scmp.ne.s32.totalorder %s854_s1, %s600_s8  ;;  %s33_s5 = int_to_ptr.vmem [resolvable:$true] %s32_s5 }
  0x18   :  { %p604_p9 = scmp.lt.u32.totalorder %s600_s8, %s854_s1 }
  0x1a   :  { %p606_p10 = pnand %p604_p9, %p601_p8 }
  0x1c   :  { %609 = shalt.err (!%p606_p10)
}
  0x1d   :  { %s610_s13 = scalar_lea.vmem %s33_s5, 128  ;;  %p615_p12 = scmp.lt.s32.totalorder %s33_s5, %s33_s5 }
  0x1e   :  { %p611_p11 = scmp.ne.s32.totalorder %s33_s5, %s610_s13  ;;  %p616_p13 = scmp.lt.s32.totalorder %s610_s13, %s610_s13 }
  0x20   :  { %p617_p0 = por %p616_p13, %p615_p12 }
  0x22   :  { %p618_p1 = pnand %p617_p0, %p611_p11 }
  0x24   :  { %621 = shalt.err (!%p618_p1)
}
  0x25   :  { %35 = dma.hbm_to_vmem [thread:$0]  %s854_s1, 128, %s33_s5, [#allocation7]  }
  0x26   :  { %644 = dma.done.wait [#allocation4], 1024  }
  0x27   :  { %645 = vsyncadd [#allocation4], 4294966272 }
  0x28   :  { %646 = dma.done.wait [#allocation7], 128  }
  0x29   :  { %647 = vsyncadd [#allocation7], 4294967168  ;;  %v114_v1 = vlaneseq  ;;  %v654_v2 = vmov 0   ;;  %v48_v6 = vld [vmem:[#allocation3 + $0x10] sm:$0xff]  ;;  %v550_v7 = vld [vmem:[%s855_s2] ss:$0 sm:$0xff] }
  0x2a   :  { %558 = vset.pattern.permute.xlu0 %v654_v2  ;;  %559 = vset.pattern.permute.xlu1 %v654_v2  ;;  %vm69_vm0 = vcmask 261120   ;;  %v46_v8 = vld [vmem:[#allocation3] sm:$0xff]  ;;  %v63_v9 = vmul.f32 %v550_v7, %v48_v6  ;;  %v49_v11 = vld [vmem:[#allocation3 + $0x18] sm:$0xff]  ;;  %v47_v12 = vld [vmem:[#allocation3 + $0x8] sm:$0xff]  ;;  %vm252_vm1 = vcmask 1041409   ;;  %vm254_vm2 = vcmask 1042434  }
  0x2b   :  { %v115_v3 = vshrl.u32 %v114_v1, 7  ;;  %v219_v4 = vand.u32 127, %v114_v1  ;;  %v61_v10 = vmul.f32 %v550_v7, %v46_v8  ;;  %v64_v13 = vmul.f32 %v550_v7, %v49_v11  ;;  %v51_v15 = vld [vmem:[#allocation3 + $0x28] sm:$0xff]  ;;  %v50_v16 = vld [vmem:[#allocation3 + $0x20] sm:$0xff]  ;;  %v53_v23 = vld [vmem:[#allocation3 + $0x38] sm:$0xff]  ;;  %s655_s1 = smov [#allocation8]  }
  0x2c   :  { %v62_v14 = vmul.f32 %v550_v7, %v47_v12  ;;  %v76_v17 = vsel %vm69_vm0, %v63_v9, 0.0  ;;  %v66_v21 = vmul.f32 %v550_v7, %v51_v15  ;;  %v65_v22 = vmul.f32 %v550_v7, %v50_v16  ;;  %v52_v24 = vld [vmem:[#allocation3 + $0x30] sm:$0xff]  ;;  %v112_v32 = vld [vmem:[#allocation6] sm:$0xff]  ;;  %v551_v37 = vld [vmem:[#allocation2] ss:$0 sm:$0xff]  ;;  %s540_s2 = sshll.u32 %s655_s1, 4  ;;  %s541_s2 = int_to_ptr.vmem [resolvable:$true] %s540_s2 }
  0x2d   :  { %v708_v5 = vsub.s32 %v219_v4, %v115_v3  ;;  %v70_v18 = vsel %vm69_vm0, %v61_v10, 0.0  ;;  %77 = vadd.xlane.f32.xlu1 %v76_v17  ;;  %v79_v19 = vsel %vm69_vm0, %v64_v13, 0.0  ;;  %v68_v27 = vmul.f32 %v550_v7, %v53_v23  ;;  %s622_s17 = scalar_lea.vmem %s541_s2, 128  ;;  %p627_p3 = scmp.lt.s32.totalorder %s541_s2, %s541_s2 }
  0x2e   :  { %71 = vadd.xlane.f32.xlu0 %v70_v18  ;;  %v73_v20 = vsel %vm69_vm0, %v62_v14, 0.0  ;;  %v85_v25 = vsel %vm69_vm0, %v66_v21, 0.0  ;;  %v82_v26 = vsel %vm69_vm0, %v65_v22, 0.0  ;;  %v67_v28 = vmul.f32 %v550_v7, %v52_v24  ;;  %p623_p2 = scmp.ne.s32.totalorder %s541_s2, %s622_s17  ;;  %p628_p4 = scmp.lt.s32.totalorder %s622_s17, %s622_s17 }
  0x2f   :  { %v91_v29 = vsel %vm69_vm0, %v68_v27, 0.0  ;;  %v721_v31 = vsub.s32 0, %v115_v3  ;;  %v724_v34 = vsub.s32 1, %v115_v3  ;;  %v727_v36 = vsub.s32 2, %v115_v3 }
  0x30   :  { %v88_v30 = vsel %vm69_vm0, %v67_v28, 0.0  ;;  %v730_v39 = vsub.s32 3, %v115_v3  ;;  %v733_v41 = vsub.s32 4, %v115_v3  ;;  %v736_v43 = vsub.s32 5, %v115_v3  ;;  %p629_p5 = por %p628_p4, %p627_p3 }
  0x31   :  { %80 = vadd.xlane.f32.xlu1 %v79_v19  ;;  %v117_v33 = vrot.slane %v112_v32, %v721_v31  ;;  %v124_v35 = vrot.slane %v112_v32, %v724_v34  ;;  %v131_v38 = vrot.slane %v112_v32, %v727_v36  ;;  %v739_v45 = vsub.s32 6, %v115_v3 }
  0x32   :  { %74 = vadd.xlane.f32.xlu0 %v73_v20  ;;  %v138_v40 = vrot.slane %v112_v32, %v730_v39  ;;  %v145_v42 = vrot.slane %v112_v32, %v733_v41  ;;  %v152_v44 = vrot.slane %v112_v32, %v736_v43  ;;  %v742_v47 = vsub.s32 7, %v115_v3  ;;  %p630_p6 = pnand %p629_p5, %p623_p2 }
  0x33   :  { %v159_v46 = vrot.slane %v112_v32, %v739_v45  ;;  %vm256_vm3 = vcmask 1043459   ;;  %vm258_vm4 = vcmask 1044484   ;;  %vm260_vm5 = vcmask 1045509  }
  0x34   :  { %v166_v48 = vrot.slane %v112_v32, %v742_v47  ;;  %vm262_vm6 = vcmask 1046534   ;;  %vm264_vm7 = vcmask 1047559   ;;  %vm267_vm8 = vcmask 64512  }
  0x35   :  { %86 = vadd.xlane.f32.xlu1 %v85_v25 }
  0x36   :  { %83 = vadd.xlane.f32.xlu0 %v82_v26 }
  0x39   :  { %92 = vadd.xlane.f32.xlu1 %v91_v29 }
  0x3a   :  { %89 = vadd.xlane.f32.xlu0 %v88_v30 }
  0x4a   :  { %119 = vbcast.lane.b32.xlu1 %v117_v33, 256 }
  0x4e   :  { %126 = vbcast.lane.b32.xlu1 %v124_v35, 256 }
  0x50   :  { %101 = vperm.xlu0 %558, %v551_v37  }
  0x52   :  { %133 = vbcast.lane.b32.xlu1 %v131_v38, 256 }
  0x56   :  { %140 = vbcast.lane.b32.xlu1 %v138_v40, 256 }
  0x5a   :  { %147 = vbcast.lane.b32.xlu1 %v145_v42, 256 }
  0x5e   :  { %154 = vbcast.lane.b32.xlu1 %v152_v44, 256 }
  0x62   :  { %161 = vbcast.lane.b32.xlu1 %v159_v46, 256 }
  0x66   :  { %168 = vbcast.lane.b32.xlu1 %v166_v48, 256 }
  0xba   :  { %v78_v49 = vpop.xlane.xlu1 %77 }
  0xbb   :  { %v72_v50 = vpop.xlane.xlu0 %71 }
  0xbe   :  { %v81_v51 = vpop.xlane.xlu1 %80 }
  0xbf   :  { %v75_v52 = vpop.xlane.xlu0 %74 }
  0xc2   :  { %v87_v53 = vpop.xlane.xlu1 %86 }
  0xc3   :  { %v84_v54 = vpop.xlane.xlu0 %83 }
  0xc6   :  { %v93_v55 = vpop.xlane.xlu1 %92 }
  0xc7   :  { %v90_v56 = vpop.xlane.xlu0 %89 }
  0xca   :  { %v120_v57 = vpop.permute.xlu1 %119 }
  0xce   :  { %v127_v58 = vpop.permute.xlu1 %126 }
  0xcf   :  { %v102_v59 = vpop.permute.xlu0 %101 }
  0xd0   :  { %v105_v60 = vadd.f32 %v102_v59, %v75_v52  ;;  %v104_v61 = vadd.f32 %v102_v59, %v72_v50  ;;  %v106_v1 = vadd.f32 %v102_v59, %v78_v49  ;;  %v107_v3 = vadd.f32 %v102_v59, %v81_v51 }
  0xd1   :  { %v108_v7 = vadd.f32 %v102_v59, %v84_v54  ;;  %v109_v10 = vadd.f32 %v102_v59, %v87_v53  ;;  %v110_v13 = vadd.f32 %v102_v59, %v90_v56  ;;  %v111_v16 = vadd.f32 %v102_v59, %v93_v55 }
  0xd2   :  { %v745_v62 = vmul.f32 %v127_v58, %v105_v60  ;;  %v747_v63 = vmul.f32 %v120_v57, %v104_v61  ;;  %v134_v0 = vpop.permute.xlu1 %133 }
  0xd3   :  { %v751_v2 = vmul.f32 %v134_v0, %v106_v1 }
  0xd4   :  { %198 = vperm.xlu1 %559, %v745_v62   ;;  %195 = vperm.xlu0 %558, %v747_v63  }
  0xd6   :  { %v141_v4 = vpop.permute.xlu1 %140 }
  0xd7   :  { %v753_v6 = vmul.f32 %v141_v4, %v107_v3 }
  0xd8   :  { %201 = vperm.xlu0 %558, %v751_v2  }
  0xd9   :  { %204 = vperm.xlu1 %559, %v753_v6  }
  0xda   :  { %v148_v8 = vpop.permute.xlu1 %147 }
  0xdb   :  { %v757_v9 = vmul.f32 %v148_v8, %v108_v7 }
  0xdd   :  { %207 = vperm.xlu0 %558, %v757_v9  }
  0xde   :  { %v155_v11 = vpop.permute.xlu1 %154 }
  0xdf   :  { %v760_v12 = vmul.f32 %v155_v11, %v109_v10 }
  0xe1   :  { %210 = vperm.xlu1 %559, %v760_v12  }
  0xe2   :  { %v162_v14 = vpop.permute.xlu1 %161 }
  0xe3   :  { %v763_v15 = vmul.f32 %v162_v14, %v110_v13 }
  0xe5   :  { %213 = vperm.xlu0 %558, %v763_v15  }
  0xe6   :  { %v169_v17 = vpop.permute.xlu1 %168 }
  0xe7   :  { %v766_v18 = vmul.f32 %v169_v17, %v111_v16 }
  0xe9   :  { %216 = vperm.xlu1 %559, %v766_v18  }
 0x153   :  { %v196_v19 = vpop.permute.xlu0 %195  ;;  %v199_v20 = vpop.permute.xlu1 %198 }
 0x154   :  { %v227_v23 = vrot.slane %v199_v20, %v708_v5  ;;  %v223_v24 = vrot.slane %v196_v19, %v708_v5 }
 0x156   :  { %v253_v28 = vsel %vm252_vm1, %v227_v23, %v223_v24 }
 0x157   :  { %v202_v21 = vpop.permute.xlu0 %201 }
 0x158   :  { %v205_v22 = vpop.permute.xlu1 %204  ;;  %v231_v25 = vrot.slane %v202_v21, %v708_v5 }
 0x159   :  { %v235_v29 = vrot.slane %v205_v22, %v708_v5 }
 0x15a   :  { %v255_v30 = vsel %vm254_vm2, %v231_v25, %v253_v28 }
 0x15b   :  { %v257_v38 = vsel %vm256_vm3, %v235_v29, %v255_v30 }
 0x15c   :  { %v208_v26 = vpop.permute.xlu0 %207 }
 0x15d   :  { %v239_v32 = vrot.slane %v208_v26, %v708_v5 }
 0x15f   :  { %v259_v40 = vsel %vm258_vm4, %v239_v32, %v257_v38 }
 0x160   :  { %v211_v27 = vpop.permute.xlu1 %210 }
 0x161   :  { %v243_v35 = vrot.slane %v211_v27, %v708_v5 }
 0x163   :  { %v261_v44 = vsel %vm260_vm5, %v243_v35, %v259_v40 }
 0x164   :  { %v214_v33 = vpop.permute.xlu0 %213 }
 0x165   :  { %v247_v37 = vrot.slane %v214_v33, %v708_v5 }
 0x167   :  { %v263_v48 = vsel %vm262_vm6, %v247_v37, %v261_v44 }
 0x168   :  { %v217_v42 = vpop.permute.xlu1 %216 }
 0x169   :  { %v251_v46 = vrot.slane %v217_v42, %v708_v5 }
 0x16b   :  { %v265_v49 = vsel %vm264_vm7, %v251_v46, %v263_v48 }
 0x16c   :  { %v268_v50 = vsel %vm267_vm8, %v265_v49, -inf }
 0x16d   :  { %269 = vmax.xlane.f32.xlu0 %v268_v50 }
 0x1fa   :  { %v270_v51 = vpop.xlane.xlu0 %269 }
 0x1fb   :  { %v275_v52 = vrot.slane %v270_v51, %v721_v31  ;;  %v279_v53 = vrot.slane %v270_v51, %v724_v34  ;;  %v283_v54 = vrot.slane %v270_v51, %v727_v36  ;;  %v287_v58 = vrot.slane %v270_v51, %v730_v39 }
 0x1fc   :  { %v291_v61 = vrot.slane %v270_v51, %v733_v41  ;;  %v295_v3 = vrot.slane %v270_v51, %v736_v43  ;;  %v299_v7 = vrot.slane %v270_v51, %v739_v45 }
 0x1fd   :  { %v312_v55 = vsub.f32 %v747_v63, %v275_v52  ;;  %v313_v56 = vsub.f32 %v745_v62, %v279_v53  ;;  %v314_v59 = vsub.f32 %v751_v2, %v283_v54  ;;  %v315_v0 = vsub.f32 %v753_v6, %v287_v58 }
 0x1fe   :  { %v316_v4 = vsub.f32 %v757_v9, %v291_v61  ;;  %v317_v2 = vsub.f32 %v760_v12, %v295_v3  ;;  %v303_v6 = vrot.slane %v270_v51, %v742_v47  ;;  %v318_v11 = vsub.f32 %v763_v15, %v299_v7 }
 0x1ff   :  { %v320_v57 = vmul.f32 1.442695, %v312_v55  ;;  %v322_v60 = vmul.f32 1.442695, %v313_v56  ;;  %v324_v1 = vmul.f32 1.442695, %v314_v59 }
 0x200   :  { %v326_v63 = vmul.f32 1.442695, %v315_v0  ;;  %v328_v8 = vmul.f32 1.442695, %v316_v4  ;;  %v330_v13 = vmul.f32 1.442695, %v317_v2  ;;  %v319_v9 = vsub.f32 %v766_v18, %v303_v6 }
 0x201   :  { %560 = vpow2.f32 %v320_v57  ;;  %v332_v16 = vmul.f32 1.442695, %v318_v11 }
 0x202   :  { %562 = vpow2.f32 %v322_v60  ;;  %v334_v12 = vmul.f32 1.442695, %v319_v9 }
 0x203   :  { %564 = vpow2.f32 %v324_v1 }
 0x204   :  { %566 = vpow2.f32 %v326_v63 }
 0x205   :  { %568 = vpow2.f32 %v328_v8 }
 0x206   :  { %570 = vpow2.f32 %v330_v13 }
 0x207   :  { %572 = vpow2.f32 %v332_v16 }
 0x208   :  { %574 = vpow2.f32 %v334_v12 }
 0x20b   :  { %v561_v62 = vpop.eup %560 }
 0x20c   :  { %345 = vperm.xlu1 %559, %v561_v62   ;;  %v563_v10 = vpop.eup %562 }
 0x20d   :  { %v565_v14 = vpop.eup %564 }
 0x20e   :  { %v567_v17 = vpop.eup %566 }
 0x20f   :  { %v569_v19 = vpop.eup %568 }
 0x210   :  { %348 = vperm.xlu1 %559, %v563_v10   ;;  %v571_v20 = vpop.eup %570 }
 0x211   :  { %v573_v21 = vpop.eup %572 }
 0x212   :  { %v575_v15 = vpop.eup %574 }
 0x214   :  { %351 = vperm.xlu1 %559, %v565_v14  }
 0x218   :  { %354 = vperm.xlu1 %559, %v567_v17  }
 0x21c   :  { %357 = vperm.xlu1 %559, %v569_v19  }
 0x220   :  { %360 = vperm.xlu1 %559, %v571_v20  }
 0x224   :  { %363 = vperm.xlu1 %559, %v573_v21  }
 0x228   :  { %366 = vperm.xlu1 %559, %v575_v15  }
 0x28b   :  { %v346_v22 = vpop.permute.xlu1 %345 }
 0x28c   :  { %v371_v29 = vrot.slane %v346_v22, %v708_v5 }
 0x28f   :  { %v349_v23 = vpop.permute.xlu1 %348 }
 0x290   :  { %v375_v27 = vrot.slane %v349_v23, %v708_v5 }
 0x292   :  { %v400_v35 = vsel %vm252_vm1, %v375_v27, %v371_v29 }
 0x293   :  { %v352_v24 = vpop.permute.xlu1 %351 }
 0x294   :  { %v379_v28 = vrot.slane %v352_v24, %v708_v5 }
 0x296   :  { %v401_v38 = vsel %vm254_vm2, %v379_v28, %v400_v35 }
 0x297   :  { %v355_v25 = vpop.permute.xlu1 %354 }
 0x298   :  { %v383_v30 = vrot.slane %v355_v25, %v708_v5 }
 0x29a   :  { %v402_v42 = vsel %vm256_vm3, %v383_v30, %v401_v38 }
 0x29b   :  { %v358_v18 = vpop.permute.xlu1 %357 }
 0x29c   :  { %v387_v32 = vrot.slane %v358_v18, %v708_v5 }
 0x29e   :  { %v403_v44 = vsel %vm258_vm4, %v387_v32, %v402_v42 }
 0x29f   :  { %v361_v26 = vpop.permute.xlu1 %360 }
 0x2a0   :  { %v391_v37 = vrot.slane %v361_v26, %v708_v5 }
 0x2a2   :  { %v404_v48 = vsel %vm260_vm5, %v391_v37, %v403_v44 }
 0x2a3   :  { %v364_v33 = vpop.permute.xlu1 %363 }
 0x2a4   :  { %v395_v40 = vrot.slane %v364_v33, %v708_v5 }
 0x2a6   :  { %v405_v50 = vsel %vm262_vm6, %v395_v40, %v404_v48 }
 0x2a7   :  { %v367_v46 = vpop.permute.xlu1 %366 }
 0x2a8   :  { %v399_v49 = vrot.slane %v367_v46, %v708_v5 }
 0x2aa   :  { %v406_v51 = vsel %vm264_vm7, %v399_v49, %v405_v50 }
 0x2ab   :  { %v408_v52 = vsel %vm267_vm8, %v406_v51, 0.0 }
 0x2ac   :  { %409 = vadd.xlane.f32.xlu0 %v408_v52 }
 0x339   :  { %v410_v53 = vpop.xlane.xlu0 %409 }
 0x33a   :  { %576 = vrcp.f32 %v410_v53 }
 0x344   :  { %v577_v54 = vpop.eup %576 }
 0x345   :  { %v420_v55 = vrot.slane %v577_v54, %v724_v34  ;;  %v416_v56 = vrot.slane %v577_v54, %v721_v31  ;;  %v444_v59 = vrot.slane %v577_v54, %v742_v47  ;;  %v424_v60 = vrot.slane %v577_v54, %v727_v36 }
 0x346   :  { %v428_v1 = vrot.slane %v577_v54, %v730_v39  ;;  %v432_v4 = vrot.slane %v577_v54, %v733_v41  ;;  %v436_v31 = vrot.slane %v577_v54, %v736_v43  ;;  %v440_v47 = vrot.slane %v577_v54, %v739_v45 }
 0x347   :  { %v454_v57 = vmul.f32 %v563_v10, %v420_v55  ;;  %v453_v58 = vmul.f32 %v561_v62, %v416_v56  ;;  %v460_v61 = vmul.f32 %v575_v15, %v444_v59  ;;  %v455_v0 = vmul.f32 %v565_v14, %v424_v60 }
 0x348   :  { %v456_v3 = vmul.f32 %v567_v17, %v428_v1  ;;  %v457_v34 = vmul.f32 %v569_v19, %v432_v4  ;;  %v458_v63 = vmul.f32 %v571_v20, %v436_v31  ;;  %v459_v36 = vmul.f32 %v573_v21, %v440_v47 }
 0x349   :  { %473 = vperm.xlu0 %558, %v454_v57   ;;  %470 = vperm.xlu1 %559, %v453_v58  }
 0x34d   :  { %491 = vperm.xlu0 %558, %v460_v61   ;;  %476 = vperm.xlu1 %559, %v455_v0  }
 0x351   :  { %479 = vperm.xlu1 %559, %v456_v3  }
 0x355   :  { %482 = vperm.xlu1 %559, %v457_v34  }
 0x359   :  { %485 = vperm.xlu1 %559, %v458_v63  }
 0x35d   :  { %488 = vperm.xlu1 %559, %v459_v36  }
 0x3c8   :  { %v471_v62 = vpop.permute.xlu1 %470  ;;  %v474_v39 = vpop.permute.xlu0 %473 }
 0x3c9   :  { %v500_v10 = vrot.slane %v474_v39, %v708_v5  ;;  %v496_v41 = vrot.slane %v471_v62, %v708_v5 }
 0x3cb   :  { %v525_v45 = vsel %vm252_vm1, %v500_v10, %v496_v41 }
 0x3cc   :  { %v477_v7 = vpop.permute.xlu1 %476  ;;  %v492_v9 = vpop.permute.xlu0 %491 }
 0x3cd   :  { %v504_v6 = vrot.slane %v477_v7, %v708_v5  ;;  %v524_v21 = vrot.slane %v492_v9, %v708_v5 }
 0x3cf   :  { %v526_v16 = vsel %vm254_vm2, %v504_v6, %v525_v45 }
 0x3d0   :  { %v480_v2 = vpop.permute.xlu1 %479 }
 0x3d1   :  { %v508_v43 = vrot.slane %v480_v2, %v708_v5 }
 0x3d3   :  { %v527_v17 = vsel %vm256_vm3, %v508_v43, %v526_v16 }
 0x3d4   :  { %v483_v8 = vpop.permute.xlu1 %482 }
 0x3d5   :  { %v512_v13 = vrot.slane %v483_v8, %v708_v5 }
 0x3d7   :  { %v528_v19 = vsel %vm258_vm4, %v512_v13, %v527_v17 }
 0x3d8   :  { %v486_v11 = vpop.permute.xlu1 %485 }
 0x3d9   :  { %v516_v14 = vrot.slane %v486_v11, %v708_v5 }
 0x3db   :  { %v529_v15 = vsel %vm260_vm5, %v516_v14, %v528_v19 }
 0x3dc   :  { %v489_v12 = vpop.permute.xlu1 %488 }
 0x3dd   :  { %v520_v20 = vrot.slane %v489_v12, %v708_v5 }
 0x3df   :  { %v530_v22 = vsel %vm262_vm6, %v520_v20, %v529_v15 }
 0x3e0   :  { %v531_v23 = vsel %vm264_vm7, %v524_v21, %v530_v22 }
 0x3e1   :  { %533 = vst.msk [vmem:[#allocation8] sm:$0xff] %vm267_vm8, %v531_v23 }
 0x3e2   :  { %633 = shalt.err (!%p630_p6)
}
 0x3e3   :  { %s634_s20 = scalar_lea.hbm %s857_s4, 128 }
 0x3e4   :  { %p635_p7 = scmp.ne.s32.totalorder %s857_s4, %s634_s20  ;;  %p638_p8 = scmp.lt.u32.totalorder %s634_s20, %s857_s4 }
 0x3e6   :  { %p640_p9 = pnand %p638_p8, %p635_p7 }
 0x3e8   :  { %643 = shalt.err (!%p640_p9)
}
 0x3e9   :  { %543 = dma.vmem_to_hbm [thread:$0]  %s541_s2, 128, %s857_s4, [#allocation5]  }
 0x3ea   :  { %648 = dma.done.wait [#allocation5], 128  }
 0x3eb   :  { %649 = vsyncadd [#allocation5], 4294967168 }
 0x3ec   :  { %547 = vsyncpa [#allocation4], 1 }
 0x3ed   :  { %548 = vsyncpa [#allocation7], 1 }
 0x3ee   :  { %549 = vsyncpa [#allocation5], 1 }

</bundles_post_ra>
